<compile_context>
chip_gen: v7x
topology: tpu7x:2x2x1
jax: 0.10.0
libtpu: 0.0.40
codegen_flags: <defaults>
</compile_context>

<pallas_src>
import jax
import jax.numpy as jnp
from jax.experimental import pallas as pl
from jax.experimental.pallas import tpu as pltpu


def _round_up(x, m):
    return ((x + m - 1) // m) * m


def _fcqsa_kernel(s_ref, a_ref, w1s_ref, w1a_ref, b1_ref, w2_ref, b2_ref,
                  w3_ref, b3_ref, o_ref):
    # All activations are [features, batch_tile] (batch packed along lanes).
    # Layer 1 (fused concat): hT = relu(W1s^T @ sT + W1a^T @ aT + b1)
    h = (jnp.dot(w1s_ref[...], s_ref[...], preferred_element_type=jnp.float32)
         + jnp.dot(w1a_ref[...], a_ref[...], preferred_element_type=jnp.float32)
         + b1_ref[...])
    h = jnp.maximum(h, 0.0)

    # Layer 2: hT = relu(W2^T @ hT + b2)
    h = jnp.dot(w2_ref[...], h, preferred_element_type=jnp.float32) + b2_ref[...]
    h = jnp.maximum(h, 0.0)

    # Output layer: [1, H] @ [H, tb] -> lane-dense [1, tb] row.
    q = jnp.dot(w3_ref[...], h, preferred_element_type=jnp.float32) + b3_ref[...]
    o_ref[...] = q.astype(o_ref.dtype)


def fcqsa_forward(state, action, params, *, tb=4096):
    """state: [B, input_dim] f32, action: [B, output_dim] f32 -> q: [B, 1] f32."""
    w1, b1, w2, b2, w3, b3 = (p.astype(jnp.float32) for p in params)
    state = state.astype(jnp.float32)
    action = action.astype(jnp.float32)
    B, state_dim = state.shape
    action_dim = action.shape[1]

    # Transposed ("batch along lanes") weight layout — tiny one-time reshapes.
    w1sT = w1[:state_dim].T          # [H1, state_dim]  (fuses the torch.cat)
    w1aT = w1[state_dim:].T          # [H1, action_dim]
    b1c = b1.reshape(-1, 1)          # [H1, 1]
    w2T = w2.T                       # [H2, H1]
    b2c = b2.reshape(-1, 1)          # [H2, 1]
    w3r = w3.reshape(1, -1)          # [1, H2]
    b3c = b3.reshape(1, 1)           # [1, 1]

    # Lane tile: multiple of 128, clamped for small batches.  Pad the batch to
    # a multiple of tb so every block tiles its array exactly.
    tb = max(128, min(tb, _round_up(B, 128)))
    tb = _round_up(tb, 128)
    B_pad = _round_up(B, tb)
    grid = (B_pad // tb,)

    # Layout plumbing: present the batch along lanes.  One fused XLA
    # transpose+pad pass over the skinny [B, 6]/[B, 2] inputs.
    pad = B_pad - B
    sT = jnp.pad(state.T, ((0, 0), (0, pad)))     # [state_dim, B_pad]
    aT = jnp.pad(action.T, ((0, 0), (0, pad)))    # [action_dim, B_pad]

    def batch_spec(rows):
        return pl.BlockSpec((rows, tb), lambda i: (0, i))

    def resident_spec(arr):
        return pl.BlockSpec(arr.shape, lambda i: (0, 0))

    out = pl.pallas_call(
        _fcqsa_kernel,
        out_shape=jax.ShapeDtypeStruct((1, B_pad), jnp.float32),
        grid=grid,
        in_specs=[
            batch_spec(state_dim),    # sT tile  [state_dim, tb]
            batch_spec(action_dim),   # aT tile  [action_dim, tb]
            resident_spec(w1sT),      # W1 (state rows)^T  — stays in VMEM
            resident_spec(w1aT),      # W1 (action rows)^T — stays in VMEM
            resident_spec(b1c),
            resident_spec(w2T),
            resident_spec(b2c),
            resident_spec(w3r),
            resident_spec(b3c),
        ],
        out_specs=pl.BlockSpec((1, tb), lambda i: (0, i)),
        compiler_params=pltpu.CompilerParams(
            dimension_semantics=("parallel",)),
    )(sT, aT, w1sT, w1aT, b1c, w2T, b2c, w3r, b3c)

    # Drop padded columns, return [B, 1] as the torch module does.
    return out[0, :B].reshape(B, 1)


def init_fcqsa_params(key, input_dim, output_dim, hidden_dims=(32, 32)):
    """Deterministic init mimicking nn.Linear's U(-1/sqrt(fan_in), 1/sqrt(fan_in)).

    Weight layout: [in_features, out_features] (transpose of nn.Linear storage,
    identical math: y = x @ W + b).  Biases are [1, out_features] rows.
    """
    dims = [input_dim + output_dim] + list(hidden_dims) + [1]
    params = []
    for fan_in, fan_out in zip(dims[:-1], dims[1:]):
        key, kw, kb = jax.random.split(key, 3)
        bound = 1.0 / jnp.sqrt(jnp.float32(fan_in))
        w = jax.random.uniform(kw, (fan_in, fan_out), jnp.float32, -bound, bound)
        b = jax.random.uniform(kb, (1, fan_out), jnp.float32, -bound, bound)
        params += [w, b]
    return tuple(params)


def fcqsa_reference(state, action, params):
    """Pure-JAX reference for correctness check."""
    w1, b1, w2, b2, w3, b3 = params
    s = jnp.concatenate([state, action], axis=1)
    s = jnp.maximum(s @ w1 + b1, 0.0)
    s = jnp.maximum(s @ w2 + b2, 0.0)
    return s @ w3 + b3


if __name__ == "__main__":
    input_dim, output_dim = 6, 2
    hidden_dims = (32, 32)

    key = jax.random.PRNGKey(0)
    kp, ks, ka, ks2, ka2 = jax.random.split(key, 5)
    params = init_fcqsa_params(kp, input_dim, output_dim, hidden_dims)

    # Small-batch check (single tile, batch padded 8 -> 128 lanes).
    B = 8
    state = jax.random.normal(ks, (B, input_dim), jnp.float32)
    action = jax.random.normal(ka, (B, output_dim), jnp.float32)
    q = jax.block_until_ready(fcqsa_forward(state, action, params))
    q_ref = fcqsa_reference(state, action, params)
    assert q.shape == (B, 1)
    assert jnp.allclose(q, q_ref, atol=1e-4, rtol=1e-4)

    # Multi-tile check (3 grid steps, batch padded 300 -> 384 lanes).
    B2 = 300
    state2 = jax.random.normal(ks2, (B2, input_dim), jnp.float32)
    action2 = jax.random.normal(ka2, (B2, output_dim), jnp.float32)
    q2 = jax.block_until_ready(fcqsa_forward(state2, action2, params, tb=128))
    q2_ref = fcqsa_reference(state2, action2, params)
    assert q2.shape == (B2, 1)
    assert jnp.allclose(q2, q2_ref, atol=1e-4, rtol=1e-4)

    print("KERNEL_OK")
</pallas_src>

<mosaic_0001>
module attributes {stable_mosaic.version = 11 : i64} {
  func.func @_fcqsa_kernel(%arg0: i32, %arg1: memref<6x128xf32, #tpu.memory_space<vmem>>, %arg2: memref<2x128xf32, #tpu.memory_space<vmem>>, %arg3: memref<32x6xf32, #tpu.memory_space<vmem>>, %arg4: memref<32x2xf32, #tpu.memory_space<vmem>>, %arg5: memref<32x1xf32, #tpu.memory_space<vmem>>, %arg6: memref<32x32xf32, #tpu.memory_space<vmem>>, %arg7: memref<32x1xf32, #tpu.memory_space<vmem>>, %arg8: memref<1x32xf32, #tpu.memory_space<vmem>>, %arg9: memref<1x1xf32, #tpu.memory_space<vmem>>, %arg10: memref<1x128xf32, #tpu.memory_space<vmem>>) attributes {dimension_semantics = [#tpu.dimension_semantics<parallel>], iteration_bounds = array<i64: 1>, scalar_prefetch = 0 : i64, scratch_operands = 0 : i64, tpu.core_type = #tpu.core_type<tc>, window_params = [{transform_indices = @transform_0, window_bounds = array<i64: 6, 128>}, {transform_indices = @transform_1, window_bounds = array<i64: 2, 128>}, {pipeline_mode = #tpu.pipeline_mode<synchronous>, transform_indices = @transform_2, window_bounds = array<i64: 32, 6>}, {pipeline_mode = #tpu.pipeline_mode<synchronous>, transform_indices = @transform_3, window_bounds = array<i64: 32, 2>}, {pipeline_mode = #tpu.pipeline_mode<synchronous>, transform_indices = @transform_4, window_bounds = array<i64: 32, 1>}, {pipeline_mode = #tpu.pipeline_mode<synchronous>, transform_indices = @transform_5, window_bounds = array<i64: 32, 32>}, {pipeline_mode = #tpu.pipeline_mode<synchronous>, transform_indices = @transform_6, window_bounds = array<i64: 32, 1>}, {pipeline_mode = #tpu.pipeline_mode<synchronous>, transform_indices = @transform_7, window_bounds = array<i64: 1, 32>}, {pipeline_mode = #tpu.pipeline_mode<synchronous>, transform_indices = @transform_8, window_bounds = array<i64: 1, 1>}, {transform_indices = @transform_9, window_bounds = array<i64: 1, 128>}]} {
    %c0 = arith.constant 0 : index
    %c0_0 = arith.constant 0 : index
    %0 = vector.load %arg3[%c0, %c0_0] : memref<32x6xf32, #tpu.memory_space<vmem>>, vector<32x6xf32>
    %c0_1 = arith.constant 0 : index
    %c0_2 = arith.constant 0 : index
    %1 = vector.load %arg1[%c0_1, %c0_2] : memref<6x128xf32, #tpu.memory_space<vmem>>, vector<6x128xf32>
    %cst = arith.constant dense<0.000000e+00> : vector<32x128xf32>
    %2 = tpu.matmul %0, %1, %cst {dimension_numbers = #tpu.dot_dimension_numbers<[1], [0], [0], [1], [0, 0, 1, 1], [], []>} : vector<32x6xf32>, vector<6x128xf32>, vector<32x128xf32> -> vector<32x128xf32>
    %c0_3 = arith.constant 0 : index
    %c0_4 = arith.constant 0 : index
    %3 = vector.load %arg4[%c0_3, %c0_4] : memref<32x2xf32, #tpu.memory_space<vmem>>, vector<32x2xf32>
    %c0_5 = arith.constant 0 : index
    %c0_6 = arith.constant 0 : index
    %4 = vector.load %arg2[%c0_5, %c0_6] : memref<2x128xf32, #tpu.memory_space<vmem>>, vector<2x128xf32>
    %cst_7 = arith.constant dense<0.000000e+00> : vector<32x128xf32>
    %5 = tpu.matmul %3, %4, %cst_7 {dimension_numbers = #tpu.dot_dimension_numbers<[1], [0], [0], [1], [0, 0, 1, 1], [], []>} : vector<32x2xf32>, vector<2x128xf32>, vector<32x128xf32> -> vector<32x128xf32>
    %6 = arith.addf %2, %5 : vector<32x128xf32>
    %c0_8 = arith.constant 0 : index
    %c0_9 = arith.constant 0 : index
    %7 = vector.load %arg5[%c0_8, %c0_9] : memref<32x1xf32, #tpu.memory_space<vmem>>, vector<32x1xf32>
    %8 = vector.broadcast %7 : vector<32x1xf32> to vector<32x128xf32>
    %9 = arith.addf %6, %8 : vector<32x128xf32>
    %cst_10 = arith.constant 0.000000e+00 : f32
    %10 = vector.broadcast %cst_10 : f32 to vector<32x128xf32>
    %11 = arith.maximumf %9, %10 : vector<32x128xf32>
    %c0_11 = arith.constant 0 : index
    %c0_12 = arith.constant 0 : index
    %12 = vector.load %arg6[%c0_11, %c0_12] : memref<32x32xf32, #tpu.memory_space<vmem>>, vector<32x32xf32>
    %cst_13 = arith.constant dense<0.000000e+00> : vector<32x128xf32>
    %13 = tpu.matmul %12, %11, %cst_13 {dimension_numbers = #tpu.dot_dimension_numbers<[1], [0], [0], [1], [0, 0, 1, 1], [], []>} : vector<32x32xf32>, vector<32x128xf32>, vector<32x128xf32> -> vector<32x128xf32>
    %c0_14 = arith.constant 0 : index
    %c0_15 = arith.constant 0 : index
    %14 = vector.load %arg7[%c0_14, %c0_15] : memref<32x1xf32, #tpu.memory_space<vmem>>, vector<32x1xf32>
    %15 = vector.broadcast %14 : vector<32x1xf32> to vector<32x128xf32>
    %16 = arith.addf %13, %15 : vector<32x128xf32>
    %cst_16 = arith.constant 0.000000e+00 : f32
    %17 = vector.broadcast %cst_16 : f32 to vector<32x128xf32>
    %18 = arith.maximumf %16, %17 : vector<32x128xf32>
    %c0_17 = arith.constant 0 : index
    %c0_18 = arith.constant 0 : index
    %19 = vector.load %arg8[%c0_17, %c0_18] : memref<1x32xf32, #tpu.memory_space<vmem>>, vector<1x32xf32>
    %cst_19 = arith.constant dense<0.000000e+00> : vector<1x128xf32>
    %20 = tpu.matmul %19, %18, %cst_19 {dimension_numbers = #tpu.dot_dimension_numbers<[1], [0], [0], [1], [0, 0, 1, 1], [], []>} : vector<1x32xf32>, vector<32x128xf32>, vector<1x128xf32> -> vector<1x128xf32>
    %c0_20 = arith.constant 0 : index
    %c0_21 = arith.constant 0 : index
    %21 = vector.load %arg9[%c0_20, %c0_21] : memref<1x1xf32, #tpu.memory_space<vmem>>, vector<1x1xf32>
    %22 = vector.broadcast %21 : vector<1x1xf32> to vector<1x128xf32>
    %23 = arith.addf %20, %22 : vector<1x128xf32>
    %c0_22 = arith.constant 0 : index
    %c0_23 = arith.constant 0 : index
    %24 = vector.load %arg10[%c0_22, %c0_23] : memref<1x128xf32, #tpu.memory_space<vmem>>, vector<1x128xf32>
    tpu.vector_store %arg10[%c0_22, %c0_23], %23 {strides = array<i32>} : memref<1x128xf32, #tpu.memory_space<vmem>>, vector<1x128xf32>,
    return
  }
  func.func @transform_0(%arg0: i32) -> (i32, i32) {
    %c0_i32 = arith.constant 0 : i32
    %c0_i32_0 = arith.constant 0 : i32
    return %c0_i32, %arg0 : i32, i32
  }
  func.func @transform_1(%arg0: i32) -> (i32, i32) {
    %c0_i32 = arith.constant 0 : i32
    %c0_i32_0 = arith.constant 0 : i32
    return %c0_i32, %arg0 : i32, i32
  }
  func.func @transform_2(%arg0: i32) -> (i32, i32) {
    %c0_i32 = arith.constant 0 : i32
    %c0_i32_0 = arith.constant 0 : i32
    %c0_i32_1 = arith.constant 0 : i32
    return %c0_i32, %c0_i32_0 : i32, i32
  }
  func.func @transform_3(%arg0: i32) -> (i32, i32) {
    %c0_i32 = arith.constant 0 : i32
    %c0_i32_0 = arith.constant 0 : i32
    %c0_i32_1 = arith.constant 0 : i32
    return %c0_i32, %c0_i32_0 : i32, i32
  }
  func.func @transform_4(%arg0: i32) -> (i32, i32) {
    %c0_i32 = arith.constant 0 : i32
    %c0_i32_0 = arith.constant 0 : i32
    %c0_i32_1 = arith.constant 0 : i32
    return %c0_i32, %c0_i32_0 : i32, i32
  }
  func.func @transform_5(%arg0: i32) -> (i32, i32) {
    %c0_i32 = arith.constant 0 : i32
    %c0_i32_0 = arith.constant 0 : i32
    %c0_i32_1 = arith.constant 0 : i32
    return %c0_i32, %c0_i32_0 : i32, i32
  }
  func.func @transform_6(%arg0: i32) -> (i32, i32) {
    %c0_i32 = arith.constant 0 : i32
    %c0_i32_0 = arith.constant 0 : i32
    %c0_i32_1 = arith.constant 0 : i32
    return %c0_i32, %c0_i32_0 : i32, i32
  }
  func.func @transform_7(%arg0: i32) -> (i32, i32) {
    %c0_i32 = arith.constant 0 : i32
    %c0_i32_0 = arith.constant 0 : i32
    %c0_i32_1 = arith.constant 0 : i32
    return %c0_i32, %c0_i32_0 : i32, i32
  }
  func.func @transform_8(%arg0: i32) -> (i32, i32) {
    %c0_i32 = arith.constant 0 : i32
    %c0_i32_0 = arith.constant 0 : i32
    %c0_i32_1 = arith.constant 0 : i32
    return %c0_i32, %c0_i32_0 : i32, i32
  }
  func.func @transform_9(%arg0: i32) -> (i32, i32) {
    %c0_i32 = arith.constant 0 : i32
    %c0_i32_0 = arith.constant 0 : i32
    return %c0_i32, %arg0 : i32, i32
  }
}

</mosaic_0001>

<bundles_post_ra>
// kernel: tpu_custom_call.1
= control target key start
LH: loop header
LB: loop body
LE: loop exit
PB: predicated region body
PF: predicated region fallthrough
CT: control target
= control target key end

     0   :  { %s790_s0 = inlined_call_operand.vmem [shape: f32[6,128], index: 0, kind: input, shape index: {}]   ;;  %s791_s1 = inlined_call_operand.vmem [shape: f32[2,128], index: 1, kind: input, shape index: {}]   ;;  %s792_s2 = inlined_call_operand.vmem [shape: f32[32,6], index: 2, kind: input, shape index: {}]   ;;  %s793_s3 = inlined_call_operand.vmem [shape: f32[32,2], index: 3, kind: input, shape index: {}]   ;;  %s794_s4 = inlined_call_operand.vmem [shape: f32[32,1], index: 4, kind: input, shape index: {}]   ;;  %s795_s5 = inlined_call_operand.vmem [shape: f32[32,32], index: 5, kind: input, shape index: {}]   ;;  %s796_s6 = inlined_call_operand.vmem [shape: f32[32,1], index: 6, kind: input, shape index: {}]   ;;  %s797_s7 = inlined_call_operand.vmem [shape: f32[1,32], index: 7, kind: input, shape index: {}]   ;;  %s798_s8 = inlined_call_operand.<no memory space> [shape: f32[1,1], index: 8, kind: input, shape index: {}]   ;;  %s799_s9 = inlined_call_operand.hbm [shape: f32[1,128], index: 9, kind: output, shape index: {}]  }
   0x1   :  { %v14_v0 = vstv %s798_s8 }
   0x2   :  { %15 = vst [vmem:[#allocation2] sm:$0x1] %v14_v0 }
   0x3   :  { %v44_v1 = vld [vmem:[%s791_s1] sm:$0x3]  ;;  %vm58_vm0 = vcmask 1041408   ;;  %vm45_vm1 = vcmask 15360   ;;  %v41_v3 = vld [vmem:[%s793_s3 + $0x8] sm:$0xff]  ;;  %vm160_vm2 = vcmask 1045504  }
   0x4   :  { %v40_v2 = vld [vmem:[%s793_s3] sm:$0xff]  ;;  %548 = vmatprep.subr.msk.mxu0 %vm58_vm0, %v44_v1  ;;  %v42_v5 = vld [vmem:[%s793_s3 + $0x10] sm:$0xff]  ;;  %v43_v7 = vld [vmem:[%s793_s3 + $0x18] sm:$0xff]  ;;  %vm147_vm3 = vcmask 48128   ;;  %v638_v10 = vmov 0  }
   0x5   :  { %550 = vmatprep.mubr.msk.f32.mxu0 %vm45_vm1, %v40_v2  ;;  %v39_v4 = vld [vmem:[%s790_s0] sm:$0x3f]  ;;  %549 = vmatpush3.msk.msra.mxu0 %vm58_vm0, %v44_v1  ;;  %v251_v8 = vld [vmem:[%s794_s4 + $0x10] sm:$0xff] }
   0x6   :  { %551 = vmatmul.mubr.msk.f32.vlgmr.msra.gmra.mrb[0].mxu0 %vm45_vm1, %v41_v3  ;;  %556 = vmatprep.subr.msk.mxu0 %vm160_vm2, %v39_v4  ;;  %v249_v6 = vld [vmem:[%s794_s4] sm:$0xff] }
   0x7   :  { %557 = vmatpush3.msk.msra.mxu0 %vm160_vm2, %v39_v4  ;;  %553 = vmatprep.mubr.msk.f32.mxu0 %vm45_vm1, %v42_v5  ;;  %v35_v9 = vld [vmem:[%s792_s2] sm:$0xff] }
   0x8   :  { %612 = vset.pattern.permute.xlu0 %v638_v10  ;;  %613 = vset.pattern.permute.xlu1 %v638_v10 }
   0x9   :  { %255 = vperm.xlu0 %612, %v249_v6   ;;  %265 = vperm.xlu1 %613, %v251_v8  }
   0xa   :  { %16 = vsyncpa [#allocation4], 0  ;;  %554 = vmatmul.mubr.msk.f32.gmra.mrb[2].mxu0 %vm45_vm1, %v43_v7  ;;  %v250_v11 = vld [vmem:[%s794_s4 + $0x8] sm:$0xff]  ;;  %v252_v12 = vld [vmem:[%s794_s4 + $0x18] sm:$0xff]  ;;  %vm309_vm4 = vcmask 261120   ;;  %v639_v43 = vmov 0.0|0.0   ;;  %v418_v0 = vlaneseq }
   0xb   :  { %558 = vmatprep.mubr.msk.f32.mxu0 %vm147_vm3, %v35_v9  ;;  %v36_v13 = vld [vmem:[%s792_s2 + $0x8] sm:$0xff]  ;;  %v37_v14 = vld [vmem:[%s792_s2 + $0x10] sm:$0xff]  ;;  %v285_v15 = vld [vmem:[%s796_s6] sm:$0xff]  ;;  %vm640_vm5 = vmmov 0   ;;  %v641_v44 = vmov 0.0   ;;  %s642_s25 = smov [#allocation3]  }
   0xc   :  { %v286_v16 = vld [vmem:[%s796_s6 + $0x8] sm:$0xff]  ;;  %v38_v17 = vld [vmem:[%s792_s2 + $0x18] sm:$0xff]  ;;  %v287_v18 = vld [vmem:[%s796_s6 + $0x10] sm:$0xff]  ;;  %v419_v1 = vshrl.u32 %v418_v0, 7  ;;  %s502_s26 = sshll.u32 %s642_s25, 4  ;;  %s503_s26 = int_to_ptr.vmem [resolvable:$true] %s502_s26 }
   0xd   :  { %260 = vperm.xlu0 %612, %v250_v11   ;;  %270 = vperm.xlu1 %613, %v252_v12   ;;  %v288_v19 = vld [vmem:[%s796_s6 + $0x18] sm:$0xff]  ;;  %v412_v20 = vld [vmem:[#allocation2] sm:$0x1]  ;;  %v282_v40 = vld [vmem:[%s795_s5 + $0x8] sm:$0xff]  ;;  %s614_s27 = scalar_lea.vmem %s503_s26, 16  ;;  %s618_s3 = scalar_lea.vmem %s503_s26, 32 }
   0xe   :  { %559 = vmatmul.mubr.msk.f32.vlgmr.msra.gmra.mrb[0].mxu0 %vm147_vm3, %v36_v13  ;;  %v281_v21 = vld [vmem:[%s795_s5] sm:$0xff]  ;;  %v283_v41 = vld [vmem:[%s795_s5 + $0x10] sm:$0xff]  ;;  %v284_v42 = vld [vmem:[%s795_s5 + $0x18] sm:$0xff]  ;;  %v420_v2 = vsub.s32 0, %v419_v1  ;;  %p615_p0 = scmp.ne.s32.totalorder %s503_s26, %s614_s27  ;;  %p619_p1 = scmp.lt.s32.totalorder %s503_s26, %s503_s26 }
   0xf   :  { %561 = vmatprep.mubr.msk.f32.mxu0 %vm147_vm3, %v37_v14  ;;  %572 = vmatprep.mubr.msk.f32.mxu1 %vm309_vm4, %v281_v21  ;;  %v411_v63 = vld [vmem:[%s797_s7] sm:$0x1]  ;;  %p620_p2 = scmp.lt.s32.totalorder %s618_s3, %s614_s27 }
  0x11   :  { %291 = vperm.xlu0 %612, %v285_v15   ;;  %296 = vperm.xlu1 %613, %v286_v16   ;;  %p621_p3 = por %p620_p2, %p619_p1 }
  0x12   :  { %562 = vmatmul.mubr.msk.f32.gmra.mrb[2].mxu0 %vm147_vm3, %v38_v17 }
  0x13   :  { %p622_p4 = pnand %p621_p3, %p615_p0 }
  0x15   :  { %301 = vperm.xlu0 %612, %v287_v18   ;;  %306 = vperm.xlu1 %613, %v288_v19  }
  0x19   :  { %415 = vperm.xlu0 %612, %v412_v20  }
  0x88   :  { %v256_v22 = vpop.permute.xlu0 %255  ;;  %v266_v23 = vpop.permute.xlu1 %265 }
  0x8c   :  { %v261_v24 = vpop.permute.xlu0 %260  ;;  %v271_v30 = vpop.permute.xlu1 %270 }
  0x90   :  { %v297_v45 = vpop.permute.xlu1 %296  ;;  %v292_v46 = vpop.permute.xlu0 %291 }
  0x94   :  { %v307_v52 = vpop.permute.xlu1 %306  ;;  %v302_v55 = vpop.permute.xlu0 %301 }
  0x98   :  { %v416_v3 = vpop.permute.xlu0 %415 }
  0x99   :  { %v421_v4 = vrot.slane %v416_v3, %v420_v2 }
  0xe1   :  { %v560_v25 = vpop.f32.mrb[0].mxu0 }
  0xe2   :  { %v274_v26 = vadd.f32 %v560_v25, %v261_v24  ;;  %v230_v27 = vpop.f32.mrb[1].mxu0 }
  0xe3   :  { %v273_v28 = vadd.f32 %v256_v22, %v230_v27 }
  0xe4   :  { %v278_v29 = vmax.f32 %v274_v26, 0.0 }
  0xe5   :  { %v277_v31 = vmax.f32 %v273_v28, 0.0  ;;  %v563_v32 = vpop.f32.mrb[2].mxu0 }
  0xe6   :  { %v276_v33 = vadd.f32 %v563_v32, %v271_v30  ;;  %v240_v34 = vpop.f32.mrb[3].mxu0 }
  0xe7   :  { %v275_v35 = vadd.f32 %v266_v23, %v240_v34  ;;  %v589_v36 = vpack.c.bf16 %v278_v29, %v277_v31 }
  0xe8   :  { %v280_v37 = vmax.f32 %v276_v33, 0.0 }
  0xe9   :  { %v279_v38 = vmax.f32 %v275_v35, 0.0  ;;  %590 = vmatprep.subr.bf16.mxu1 %v589_v36 }
  0xea   :  { %592 = vmatpush3.bf16.msra.mxu1 %v589_v36 }
  0xeb   :  { %v593_v39 = vpack.c.bf16 %v280_v37, %v279_v38 }
  0xed   :  { %594 = vmatprep.subr.bf16.mxu1 %v593_v39 }
  0xee   :  { %596 = vmatpush3.bf16.msra.mxu1 %v593_v39 }
  0xef   :  { %597 = vmatprep.subr.bf16.mxu1 %v639_v43 }
  0xf1   :  { %573 = vmatmul.mubr.msk.f32.vlgmr.msra.gmra.mrb[0].mxu1 %vm309_vm4, %v282_v40 }
  0xf2   :  { %575 = vmatprep.mubr.msk.f32.mxu1 %vm309_vm4, %v283_v41 }
  0xf5   :  { %576 = vmatmul.mubr.msk.f32.gmra.mrb[2].mxu1 %vm309_vm4, %v284_v42 }
  0xf6   :  { %586 = vmatprep.mubr.msk.f32.mxu1 %vm640_vm5, %v641_v44 }
 0x1c4   :  { %v574_v47 = vpop.f32.mrb[0].mxu1 }
 0x1c5   :  { %v394_v48 = vadd.f32 %v574_v47, %v297_v45  ;;  %v388_v49 = vpop.f32.mrb[1].mxu1 }
 0x1c6   :  { %v389_v50 = vadd.f32 %v388_v49, %v292_v46 }
 0x1c7   :  { %v408_v51 = vmax.f32 %v394_v48, 0.0 }
 0x1c8   :  { %v407_v53 = vmax.f32 %v389_v50, 0.0  ;;  %v577_v54 = vpop.f32.mrb[2].mxu1 }
 0x1c9   :  { %v404_v56 = vadd.f32 %v577_v54, %v307_v52  ;;  %v398_v57 = vpop.f32.mrb[3].mxu1 }
 0x1ca   :  { %v598_v58 = vpack.c.bf16 %v408_v51, %v407_v53  ;;  %v399_v59 = vadd.f32 %v398_v57, %v302_v55 }
 0x1cb   :  { %v410_v60 = vmax.f32 %v404_v56, 0.0 }
 0x1cc   :  { %v409_v61 = vmax.f32 %v399_v59, 0.0  ;;  %599 = vmatpush3.bf16.msra.mxu1 %v598_v58 }
 0x1cd   :  { %600 = vmatprep.subr.bf16.mxu1 %v639_v43 }
 0x1ce   :  { %v601_v62 = vpack.c.bf16 %v410_v60, %v409_v61 }
 0x1d0   :  { %602 = vmatpush3.bf16.msra.mxu1 %v601_v62 }
 0x1d3   :  { %587 = vmatmul.mubr.msk.f32.vlgmr.msra.gmra.mrb[4].mxu1 %vm309_vm4, %v411_v63 }
 0x2a6   :  { %v491_v5 = vpop.f32.mrb[4].mxu1 }
 0x2a7   :  { %v492_v6 = vadd.f32 %v491_v5, %v421_v4  ;;  %v588_v7 = vpop.f32.mrb[5].mxu1 }
 0x2a9   :  { %495 = vst [vmem:[#allocation3] sm:$0x1] %v492_v6 }
 0x2aa   :  { %625 = shalt.err (!%p622_p4)
}
 0x2ab   :  { %s626_s29 = scalar_lea.hbm %s799_s9, 16 }
 0x2ac   :  { %p627_p5 = scmp.ne.s32.totalorder %s799_s9, %s626_s29  ;;  %p630_p6 = scmp.lt.u32.totalorder %s626_s29, %s799_s9 }
 0x2ae   :  { %p632_p7 = pnand %p630_p6, %p627_p5 }
 0x2b0   :  { %635 = shalt.err (!%p632_p7)
}
 0x2b1   :  { %505 = dma.vmem_to_hbm [thread:$0]  %s503_s26, 16, %s799_s9, [#allocation4]  }
 0x2b2   :  { %636 = dma.done.wait [#allocation4], 16  }
 0x2b3   :  { %637 = vsyncadd [#allocation4], 4294967280 }
 0x2b4   :  { %509 = vsyncpa [#allocation4], 1 }

</bundles_post_ra>
